<compile_context>
chip_gen: v5e
topology: v5e:2x2
jax: 0.10.0
libtpu: 0.0.40
codegen_flags: <defaults>
</compile_context>

<pallas_src>
import functools
import math

import jax
import jax.numpy as jnp
from jax.experimental import pallas as pl
from jax.experimental.pallas import tpu as pltpu

_LOG_SMOOTH = math.log(1e-4)  # log of the clamped-to-1e-4 one-hot "zeros"


def _nrce_kernel(pred_ref, labels_ref, out_ref, *, valid_rows):
    tb = pred_ref.shape[0]
    logits = pred_ref[...].astype(jnp.float32)                      # (tb, C)

    # Numerically stable softmax along the class (lane) axis.
    m = jnp.max(logits, axis=1, keepdims=True)                      # (tb, 1)
    e = jnp.exp(logits - m)                                         # (tb, C)
    s = jnp.sum(e, axis=1, keepdims=True)                           # (tb, 1)
    inv = pl.reciprocal(s, approx=False)                            # column-only reciprocal
    p = jnp.maximum(e * inv, jnp.float32(1e-7))                     # clamp lower; upper clip is a no-op

    # rce = -log(1e-4) * sum_{j != label} p_j  (log term is 0 on the label lane).
    cls = jax.lax.broadcasted_iota(jnp.int32, p.shape, 1)           # (tb, C)
    off_label = jnp.where(cls == labels_ref[...], jnp.float32(0.0), p)
    rce = jnp.sum(off_label, axis=1, keepdims=True)                 # (tb, 1), sans -log(1e-4)

    # Mask rows past the real batch (un-padded cdiv grid tail reads garbage).
    row = pl.program_id(0) * tb + jax.lax.broadcasted_iota(jnp.int32, rce.shape, 0)
    rce = jnp.where(row < valid_rows, rce, jnp.float32(0.0))

    # Lane-dense store: this tile's partial sum replicated across one (8,128) vreg.
    partial = jnp.sum(rce, axis=0, keepdims=True)                   # (1, 1)
    out_ref[...] = jnp.broadcast_to(partial, out_ref.shape)


def _round_up(x, m):
    return ((x + m - 1) // m) * m


def _vmem_capacity_bytes():
    try:
        cap = int(getattr(pltpu.get_tpu_info(), "vmem_capacity_bytes", 0))
        if cap > 0:
            return cap
    except Exception:
        pass
    return 64 << 20  # conservative (v7x-sized) fallback


def _pick_batch_tile(n, c, in_itemsize, vmem_cap):
    """Byte-sized row tile from a generation-gated VMEM budget."""
    c_pad = _round_up(max(c, 1), 128)
    # Per-row VMEM with real lane padding:
    #   pred double-buffer + labels double-buffer ((tb,1) pads to 128 lanes) + f32 temps.
    per_row = 2 * c_pad * in_itemsize + 2 * 128 * 4 + 4 * c_pad * 4
    if vmem_cap >= (100 << 20):        # 128 MiB parts (v5e / v6e)
        budget = 64 << 20
    else:                              # 64 MiB parts (v7x)
        budget = 24 << 20
    tb = max(8, (budget // per_row) // 8 * 8)
    if vmem_cap < (100 << 20) and n > 8:
        # Dual-TC part: guarantee >= 2 grid steps so "parallel" engages both cores.
        tb = min(tb, _round_up(pl.cdiv(n, 2), 8))
    return int(tb)


def normalized_reverse_cross_entropy(pred, labels, num_classes, scale=1.0, *, tb=None):
    """pred: (N, num_classes) float (f32 or bf16), labels: (N,) int. Returns scalar f32."""
    n, c = pred.shape
    assert c == num_classes

    in_itemsize = jnp.dtype(pred.dtype).itemsize
    vmem_cap = _vmem_capacity_bytes()

    if tb is None:
        tb = _pick_batch_tile(n, c, in_itemsize, vmem_cap)
    tb = max(8, (int(tb) // 8) * 8)
    if tb >= n:
        tb = n  # single full-batch block (full-dim block is legal even if n % 8 != 0)

    num_tiles = int(pl.cdiv(n, tb))    # un-padded grid; tail rows masked in-kernel
    labels2d = labels.astype(jnp.int32).reshape(n, 1)

    # VMEM accounting with the real 8-sublane / 128-lane padding of every tile.
    rows = _round_up(tb, 8)
    c_pad = _round_up(c, 128)
    vmem_needed = (2 * rows * c_pad * in_itemsize   # pred double buffer
                   + 2 * rows * 128 * 4             # labels double buffer (padded to 128 lanes)
                   + 4 * rows * c_pad * 4           # in-kernel f32 temporaries
                   + 2 * 8 * 128 * 4                # output double buffer
                   + (2 << 20))                     # headroom
    ceiling = (96 << 20) if vmem_cap >= (100 << 20) else (48 << 20)
    vmem_limit = int(min(max(vmem_needed, 16 << 20), ceiling))

    kernel = functools.partial(_nrce_kernel, valid_rows=n)
    partials = pl.pallas_call(
        kernel,
        out_shape=jax.ShapeDtypeStruct((num_tiles * 8, 128), jnp.float32),
        grid_spec=pltpu.PrefetchScalarGridSpec(
            num_scalar_prefetch=0,
            grid=(num_tiles,),
            in_specs=[
                pl.BlockSpec((tb, c), lambda i: (i, 0)),
                pl.BlockSpec((tb, 1), lambda i: (i, 0)),
            ],
            out_specs=pl.BlockSpec((8, 128), lambda i: (i, 0)),
        ),
        compiler_params=pltpu.CompilerParams(
            dimension_semantics=("parallel",),      # distinct output block per grid step
            vmem_limit_bytes=vmem_limit,
        ),
    )(pred, labels2d)

    # Each tile's partial sum is replicated across its (8, 128) block; read one lane.
    per_tile = partials.reshape(num_tiles, 8, 128)[:, 0, 0]
    normalizor = 0.25 * (num_classes - 1)
    mean_rce = (-_LOG_SMOOTH) * jnp.sum(per_tile) / n
    return (scale * normalizor * mean_rce).astype(jnp.float32)


def _reference(pred, labels, num_classes, scale=1.0):
    p = jax.nn.softmax(pred.astype(jnp.float32), axis=1)
    p = jnp.clip(p, 1e-7, 1.0)
    onehot = jax.nn.one_hot(labels, num_classes, dtype=jnp.float32)
    onehot = jnp.clip(onehot, 1e-4, 1.0)
    normalizor = 1.0 / 4.0 * (num_classes - 1)
    rce = -jnp.sum(p * jnp.log(onehot), axis=1)
    return scale * normalizor * jnp.mean(rce)


if __name__ == "__main__":
    num_classes = 10
    batch = 16
    scale = 1.0

    key = jax.random.PRNGKey(0)
    kp, kl = jax.random.split(key)
    pred = jax.random.normal(kp, (batch, num_classes), dtype=jnp.float32)
    labels = jax.random.randint(kl, (batch,), 0, num_classes, dtype=jnp.int32)

    out = normalized_reverse_cross_entropy(pred, labels, num_classes, scale)
    out = jax.block_until_ready(out)

    ref = _reference(pred, labels, num_classes, scale)
    assert jnp.allclose(out, ref, rtol=1e-5, atol=1e-5), (out, ref)

    print("KERNEL_OK")
</pallas_src>

<mosaic_0001>
module attributes {stable_mosaic.version = 11 : i64} {
  func.func @_nrce_kernel(%arg0: i32, %arg1: memref<8x10xf32, #tpu.memory_space<vmem>>, %arg2: memref<8x1xi32, #tpu.memory_space<vmem>>, %arg3: memref<8x128xf32, #tpu.memory_space<vmem>>) attributes {dimension_semantics = [#tpu.dimension_semantics<parallel>], iteration_bounds = array<i64: 2>, scalar_prefetch = 0 : i64, scratch_operands = 0 : i64, tpu.core_type = #tpu.core_type<tc>, window_params = [{transform_indices = @transform_0, window_bounds = array<i64: 8, 10>}, {transform_indices = @transform_1, window_bounds = array<i64: 8, 1>}, {transform_indices = @transform_2, window_bounds = array<i64: 8, 128>}]} {
    %c0 = arith.constant 0 : index
    %c0_0 = arith.constant 0 : index
    %0 = vector.load %arg1[%c0, %c0_0] : memref<8x10xf32, #tpu.memory_space<vmem>>, vector<8x10xf32>
    %cst = arith.constant dense<0xFF800000> : vector<8xf32>
    %1 = vector.multi_reduction <maximumf>, %0, %cst [1] : vector<8x10xf32> to vector<8xf32>
    %2 = vector.shape_cast %1 : vector<8xf32> to vector<8x1xf32>
    %3 = vector.broadcast %2 : vector<8x1xf32> to vector<8x10xf32>
    %4 = arith.subf %0, %3 : vector<8x10xf32>
    %5 = math.exp %4 : vector<8x10xf32>
    %cst_1 = arith.constant dense<0.000000e+00> : vector<8xf32>
    %6 = vector.multi_reduction <add>, %5, %cst_1 [1] : vector<8x10xf32> to vector<8xf32>
    %7 = vector.shape_cast %6 : vector<8xf32> to vector<8x1xf32>
    %8 = tpu.reciprocal %7 : vector<8x1xf32> -> vector<8x1xf32>
    %9 = vector.broadcast %8 : vector<8x1xf32> to vector<8x10xf32>
    %10 = arith.mulf %5, %9 : vector<8x10xf32>
    %cst_2 = arith.constant 1.000000e-07 : f32
    %11 = vector.broadcast %cst_2 : f32 to vector<8x10xf32>
    %12 = arith.maximumf %10, %11 : vector<8x10xf32>
    %13 = tpu.iota {dimensions = array<i32: 1>} : vector<8x10xi32>
    %c0_3 = arith.constant 0 : index
    %c0_4 = arith.constant 0 : index
    %14 = vector.load %arg2[%c0_3, %c0_4] : memref<8x1xi32, #tpu.memory_space<vmem>>, vector<8x1xi32>
    %15 = vector.broadcast %14 : vector<8x1xi32> to vector<8x10xi32>
    %16 = arith.cmpi eq, %13, %15 : vector<8x10xi32>
    %cst_5 = arith.constant 0.000000e+00 : f32
    %17 = vector.broadcast %cst_5 : f32 to vector<8x10xf32>
    %18 = arith.select %16, %17, %12 : vector<8x10xi1>, vector<8x10xf32>
    %cst_6 = arith.constant dense<0.000000e+00> : vector<8xf32>
    %19 = vector.multi_reduction <add>, %18, %cst_6 [1] : vector<8x10xf32> to vector<8xf32>
    %20 = vector.shape_cast %19 : vector<8xf32> to vector<8x1xf32>
    %c8_i32 = arith.constant 8 : i32
    %21 = arith.muli %arg0, %c8_i32 : i32
    %22 = tpu.iota {dimensions = array<i32: 0>} : vector<8x1xi32>
    %23 = vector.broadcast %21 : i32 to vector<8x1xi32>
    %24 = arith.addi %23, %22 : vector<8x1xi32>
    %c16_i32 = arith.constant 16 : i32
    %25 = vector.broadcast %c16_i32 : i32 to vector<8x1xi32>
    %26 = arith.cmpi slt, %24, %25 : vector<8x1xi32>
    %cst_7 = arith.constant 0.000000e+00 : f32
    %27 = vector.broadcast %cst_7 : f32 to vector<8x1xf32>
    %28 = arith.select %26, %20, %27 : vector<8x1xi1>, vector<8x1xf32>
    %cst_8 = arith.constant dense<0.000000e+00> : vector<1xf32>
    %29 = vector.multi_reduction <add>, %28, %cst_8 [0] : vector<8x1xf32> to vector<1xf32>
    %30 = vector.shape_cast %29 : vector<1xf32> to vector<1x1xf32>
    %31 = vector.shape_cast %30 : vector<1x1xf32> to vector<1x1xf32>
    %32 = vector.broadcast %31 : vector<1x1xf32> to vector<8x128xf32>
    %c0_9 = arith.constant 0 : index
    %c0_10 = arith.constant 0 : index
    %33 = vector.load %arg3[%c0_9, %c0_10] : memref<8x128xf32, #tpu.memory_space<vmem>>, vector<8x128xf32>
    tpu.vector_store %arg3[%c0_9, %c0_10], %32 {strides = array<i32>} : memref<8x128xf32, #tpu.memory_space<vmem>>, vector<8x128xf32>,
    return
  }
  func.func @transform_0(%arg0: i32) -> (i32, i32) {
    %c0_i32 = arith.constant 0 : i32
    %c0_i32_0 = arith.constant 0 : i32
    return %arg0, %c0_i32 : i32, i32
  }
  func.func @transform_1(%arg0: i32) -> (i32, i32) {
    %c0_i32 = arith.constant 0 : i32
    %c0_i32_0 = arith.constant 0 : i32
    return %arg0, %c0_i32 : i32, i32
  }
  func.func @transform_2(%arg0: i32) -> (i32, i32) {
    %c0_i32 = arith.constant 0 : i32
    %c0_i32_0 = arith.constant 0 : i32
    return %arg0, %c0_i32 : i32, i32
  }
}

</mosaic_0001>

<bundles_post_ra>
// kernel: tpu_custom_call.1
= control target key start
LH: loop header
LB: loop body
LE: loop exit
PB: predicated region body
PF: predicated region fallthrough
CT: control target
= control target key end

     0   :  { %7 = vsyncpa [#allocation3], 0  ;;  %s524_s0 = inlined_call_operand.vmem [shape: f32[16,10], index: 0, kind: input, shape index: {}]   ;;  %s525_s1 = inlined_call_operand.vmem [shape: s32[16,1], index: 1, kind: input, shape index: {}]   ;;  %s526_s2 = inlined_call_operand.hbm [shape: f32[16,128], index: 2, kind: output, shape index: {}]  }
   0x1   :  { %9 = vsyncpa [#allocation3 + $0x1], 0  ;;  %s433_s9 = smov 0   ;;  %s435_s10 = smov 0  }
   0x2   :  { %s437_s11 = smov 0   ;;  %s439_s12 = smov 0  }
   0x3 LB: > { %s454_s13 = sadd.s32 4294967295, %s415_s12   ;;  %s295_s14 = sadd.s32 4294967294, %s415_s12   ;;  %s415_s12 = sphi %s439_s12, %s532_s12   ;;  %s411_s11 = sphi %s437_s11, %s531_s11   ;;  %s407_s10 = sphi %s435_s10, %s530_s10   ;;  %s403_s9 = sphi %s433_s9, %s529_s9  }
   0x4   : > { %s458_s15 = sadd.s32 1, %s415_s12   ;;  %s74_s16 = sadd.s32 1, %s411_s11 }
   0x5   : > { %s71_s17 = ssub.s32 %s415_s12, %s458_s15  ;;  %p84_p0 = scmp.ne.s32.totalorder %s411_s11, %s407_s10 }
   0x6   : > { %p72_p1 = scmp.eq.s32.totalorder %s71_s17, 0  ;;  %p85_p2 = scmp.eq.s32.totalorder %s454_s13, 1 }
   0x7   : > { %p90_p3 = scmp.ne.s32.totalorder %s407_s10, %s403_s9  ;;  %p91_p4 = scmp.eq.s32.totalorder %s295_s14, 1 }
   0x8   : > { %s469_s18 = scalar_select %p72_p1, %s411_s11, %s74_s16  }
   0x9   : > { %p471_p5 = por %p85_p2, %p84_p0  ;;  %p475_p6 = por %p91_p4, %p90_p3 }
   0xa   : > { %p298_p7 = scmp.ge.s32.totalorder %s415_s12, 1  ;;  %p123_p8 = scmp.lt.s32.totalorder %s415_s12, 3 }
   0xc   : > { %p124_p9 = pnand %p298_p7, %p123_p8 }
   0xd   : > { %p148_p10 = scmp.lt.s32.totalorder (!%p124_p9), %s454_s13, 1  ;;  %s302_s29 = sshll.u32 (!%p124_p9), %s454_s13, 3 }
   0xe   : > { %127 = sbr.rel (%p124_p9) target bundleno = 424 (0x1a8), region = 28  ;;  %s145_s30 = sand.u32 (!%p124_p9), 1, %s407_s10  }
   0xf   : > { %s299_s3 = sshll.u32 (!%p124_p9), %s145_s30, 3  ;;  %s219_s6 = scalar_lea.hbm (!%p124_p9), %s526_s2, %s302_s29 }
  0x10   : > { %s147_s7 = scalar_lea.vmem (!%p124_p9), [#allocation2], %s299_s3  ;;  %s209_s14 = scalar_lea.sflag (!%p124_p9), [#allocation3], %s145_s30 }
  0x11   : > { %s221_s8 = sshll.u32 (!%p124_p9), %s147_s7, 4  ;;  %s373_s23 = scalar_lea.hbm (!%p124_p9), %s526_s2, 16  ;;  %s222_s8 = int_to_ptr.vmem [resolvable:$true] %s221_s8 }
  0x13   : > { %s149_s21 = scalar_select %p148_p10, %s454_s13, 1  ;;  %vm157_vm0 = vcmask 80896   ;;  %v417_v3 = vmov 0   ;;  %v183_v14 = vlaneseq  ;;  %v197_v28 = vstv %s302_s29 }
  0x14   : > { %347 = vset.pattern.permute.xlu1 %v417_v3  ;;  %348 = vset.pattern.permute.xlu0 %v417_v3  ;;  %s223_s13 = sshll.u32 %s219_s6, 4  ;;  %s224_s13 = int_to_ptr.hbm [resolvable:$true] %s223_s13 }
  0x15   : > { %s300_s22 = sshll.u32 %s149_s21, 3  ;;  %v184_v19 = vand.u32 127, %v183_v14  ;;  %v196_v27 = vshrl.u32 %v183_v14, 7  ;;  %s367_s16 = sshra.s32 %s224_s13, 4  ;;  %s368_s16 = int_to_ptr.hbm [resolvable:$true] %s367_s16 }
  0x16   : > { %s151_s25 = scalar_lea.vmem %s524_s0, %s300_s22  ;;  %s155_s28 = scalar_lea.vmem %s525_s1, %s300_s22 }
  0x17   : > { %v156_v0 = vld [vmem:[%s151_s25] sm:$0xff]  ;;  %v198_v29 = vadd.s32 %v197_v28, %v196_v27  ;;  %s369_s17 = scalar_lea.hbm %s368_s16, 8  ;;  %p374_p0 = scmp.lt.s32.totalorder %s368_s16, %s526_s2 }
  0x18   : > { %v158_v1 = vsel %vm157_vm0, %v156_v0, -inf  ;;  %v185_v2 = vld [vmem:[%s155_s28] sm:$0xff]  ;;  %p370_p11 = scmp.ne.s32.totalorder %s368_s16, %s369_s17  ;;  %p375_p1 = scmp.lt.s32.totalorder %s373_s23, %s369_s17 }
  0x19   : > { %159 = vmax.xlane.f32.xlu0 %v158_v1  ;;  %187 = vperm.xlu1 %347, %v185_v2   ;;  %vm199_vm6 = vcmp.lt.s32.totalorder %v198_v29, 16 }
  0x1a   : > { %p371_p12 = pnand %p370_p11, %p471_p5  ;;  %p376_p2 = por %p375_p1, %p374_p0 }
  0x1c   : > { %p372_p13 = pneg %p371_p12 }
  0x1e   : > { %p377_p3 = pnand %p376_p2, %p372_p13 }
  0x8b   : > { %v188_v20 = vpop.permute.xlu1 %187 }
  0x8c   : > { %v160_v4 = vpop.xlane.xlu0 %159  ;;  %vm189_vm5 = vcmp.eq.s32.totalorder %v184_v19, %v188_v20 }
  0x8d   : > { %v161_v5 = vsub.f32 %v156_v0, %v160_v4 }
  0x8f   : > { %v162_v6 = vmul.f32 1.442695, %v161_v5 }
  0x91   : > { %349 = vpow2.f32 %v162_v6 }
  0x97   : > { %v350_v7 = vpop.eup %349 }
  0x98   : > { %v164_v8 = vsel %vm157_vm0, %v350_v7, 0.0 }
  0x99   : > { %165 = vadd.xlane.f32.xlu0 %v164_v8 }
 0x10c   : > { %v166_v9 = vpop.xlane.xlu0 %165 }
 0x10d   : > { %351 = vrcp.f32 %v166_v9  ;;  %v178_v13 = vand.u32 2147483648, %v166_v9  ;;  %v176_v16 = vand.u32 2147483647, %v166_v9  ;;  %vm172_vm2 = vweird.f32 %v166_v9 }
 0x10f   : > { %v179_v18 = vor.u32 1.1754944e-38, %v178_v13  ;;  %vm177_vm4 = vcmp.eq.f32.partialorder %v176_v16, 8.507059e+37 }
 0x113   : > { %v352_v10 = vpop.eup %351 }
 0x114   : > { %v168_v11 = vmul.f32 %v352_v10, %v166_v9  ;;  %vm173_vm1 = vweird.f32 %v352_v10 }
 0x115   : > { %vm174_vm3 = vmor %vm172_vm2, %vm173_vm1 }
 0x116   : > { %v169_v12 = vsub.f32 1.0, %v168_v11 }
 0x118   : > { %v170_v15 = vmul.f32 %v352_v10, %v169_v12 }
 0x11a   : > { %v171_v17 = vadd.f32 %v352_v10, %v170_v15 }
 0x11c   : > { %v175_v21 = vsel %vm174_vm3, %v352_v10, %v171_v17 }
 0x11d   : > { %v180_v22 = vsel %vm177_vm4, %v179_v18, %v175_v21 }
 0x11e   : > { %v181_v23 = vmul.f32 %v350_v7, %v180_v22 }
 0x120   : > { %v182_v24 = vmax.f32 %v181_v23, 1e-07 }
 0x122   : > { %v190_v25 = vsel %vm189_vm5, 0.0, %v182_v24 }
 0x123   : > { %v191_v26 = vsel %vm157_vm0, %v190_v25, 0.0 }
 0x124   : > { %192 = vadd.xlane.f32.xlu1 %v191_v26 }
 0x197   : > { %v193_v30 = vpop.xlane.xlu1 %192 }
 0x198   : > { %v200_v31 = vsel %vm199_vm6, %v193_v30, 0.0 }
 0x199   : > { %v201_v32 = vrot.slane %v200_v31, 4 }
 0x19b   : > { %v202_v33 = vadd.f32 %v201_v32, %v200_v31 }
 0x19d   : > { %v203_v34 = vrot.slane %v202_v33, 2 }
 0x19f   : > { %v204_v35 = vadd.f32 %v203_v34, %v202_v33 }
 0x1a1   : > { %v205_v36 = vrot.slane %v204_v35, 1 }
 0x1a3   : > { %v206_v37 = vadd.f32 %v205_v36, %v204_v35 }
 0x1a5   : > { %207 = vst [vmem:[%s147_s7] sm:$0xff] %v206_v37 }
 0x1a6   : > { %380 = shalt.err (!%p377_p3)
}
 0x1a7   : > { %307 = dma.vmem_to_hbm [thread:$0]  (%p471_p5), %s222_s8, 128, %s224_s13, %s209_s14  }
 0x1a8 PF: > { %p313_p4 = scmp.ge.s32.totalorder %s415_s12, 2  ;;  %s235_s26 = sand.u32 1, %s403_s9  }
 0x1a9   : > { %s236_s27 = scalar_lea.sflag [#allocation3], %s235_s26 }
 0x1aa   : > { %p310_p7 = pnand %p313_p4, %p475_p6 }
 0x1ac   : > { %p311_p8 = pneg %p310_p7 }
 0x1ae   : > { %398 = dma.done.wait (%p311_p8), %s236_s27, 128  }
 0x1af   : > { %400 = vsyncadd (%p311_p8), %s236_s27, 4294967168  ;;  %p12_p9 = scmp.ge.s32.totalorder %s458_s15, 4   ;;  %s529_s9 = smov %s407_s10 }
 0x1b0   : > { %s530_s10 = smov %s411_s11  ;;  %s531_s11 = smov %s469_s18 }
 0x1b1   : > { %s532_s12 = smov %s458_s15  ;;  %14 = sbr.rel (!%p12_p9) target bundleno = 3 (0x3), region = 66 }
 0x1b6   :  { %242 = vsyncpa [#allocation3], 1 }
 0x1b7   :  { %244 = vsyncpa [#allocation3 + $0x1], 1 }

</bundles_post_ra>
